<compile_context>
chip_gen: v7x
topology: tpu7x:2x2x1
jax: 0.10.0
libtpu: 0.0.40
codegen_flags: <defaults>
</compile_context>

<pallas_src>
import functools

import numpy as np
import jax
import jax.numpy as jnp
from jax.experimental import pallas as pl
from jax.experimental.pallas import tpu as pltpu


# --------------------------------------------------------------------------- #
# Kernel
# --------------------------------------------------------------------------- #
def attention_agg_kernel(counts_ref, sa_ref, sb_ref, ne_ref, mask_ref, out_ref,
                         acc_ref, rs_ref, *, b_dim, use_ones_col):
    # counts_ref: (gm*gk,) int32 SMEM   nonzeros per (row-tile, col-tile)
    # sa_ref    : (TM, 1)   f32         feature_a @ a1 for this row tile
    # sb_ref    : (1, TN)   f32         (new_emb @ a2)^T for this col tile
    # ne_ref    : (TN, Dp)  matmul dtype new_emb tile (lane-padded, opt. ones col)
    # mask_ref  : (TM, TN)  int8        adjacency tile
    # out_ref   : (TM, Dp)  f32         output row tile (written at k == last)
    # acc_ref   : (TM, Dp)  f32 scratch weighted-sum accumulator
    # rs_ref    : (TM, 1)   f32 scratch row-sum accumulator (sum path only)
    i = pl.program_id(0)
    k = pl.program_id(1)
    nk = pl.num_programs(1)

    @pl.when(k == 0)
    def _init():
        acc_ref[...] = jnp.zeros_like(acc_ref)
        rs_ref[...] = jnp.zeros_like(rs_ref)

    # Skip completely empty adjacency tiles (very common for sparse graphs).
    @pl.when(counts_ref[i * nk + k] > 0)
    def _accumulate():
        logits = sa_ref[...] + sb_ref[...]                        # (TM, TN) VPU bcast add
        # exp(F.elu(logits, 0.1)) with exp(logits) computed once and reused.
        e = jnp.exp(logits)
        w = jnp.where(logits > 0, e, jnp.exp(0.1 * (e - 1.0)))    # select, not multiply
        w = jnp.where(mask_ref[...] != 0, w, 0.0)                 # zero non-edges / padding
        acc_ref[...] += jnp.dot(w.astype(ne_ref.dtype), ne_ref[...],
                                preferred_element_type=jnp.float32)  # MXU
        if not use_ones_col:
            rs_ref[...] += jnp.sum(w, axis=-1, keepdims=True)     # XLU fallback path

    @pl.when(k == nk - 1)
    def _finalize():
        acc = acc_ref[...]
        if use_ones_col:
            rs = acc[:, b_dim:b_dim + 1]          # row_sum came out of the MXU
        else:
            rs = rs_ref[...]
        rs = jnp.where(rs == 0.0, 1.0, rs)        # isolated-node guard
        out_ref[...] = (acc / rs).astype(out_ref.dtype)   # exact divide (parity)


# --------------------------------------------------------------------------- #
# Tiling / VMEM helpers
# --------------------------------------------------------------------------- #
def _vmem_capacity_bytes():
    """Best-effort physical VMEM query; conservative 64 MiB (v7x per-TC) fallback."""
    try:
        cap = pltpu.get_tpu_info().vmem_capacity_bytes
        if cap and cap > 0:
            return int(cap)
    except Exception:
        pass
    return 64 * 1024 * 1024


def _choose_tile_m(na, max_tile):
    """Largest row tile <= max_tile that keeps blocks legal and leaves >= 2 row
    tiles (so the 'parallel' axis can shard across both v7x TensorCores)."""
    cap = min(max_tile, na)
    if na >= 16:
        cap = min(cap, max(8, na // 2))
    for t in range(cap, 7, -1):
        if t % 8 == 0 and na % t == 0:
            return t
    # Awkward Na (not a multiple of 8): single full-extent block.  Callers with
    # large awkward graphs should pad node_num_a to a multiple of 8.
    return na


def _choose_tile_n(nbp, max_tile=512):
    """Largest multiple-of-128 column tile dividing the padded Nb."""
    if nbp <= max_tile:
        return nbp
    for t in range(max_tile, 127, -128):
        if nbp % t == 0:
            return t
    return 128


def _vmem_estimate(tile_m, tile_n, dp, ne_itemsize):
    """Double-buffered block footprint + scratch + in-kernel f32 temporaries,
    including (8,128) tile padding of the skinny blocks."""
    pad8 = lambda x: -(-x // 8) * 8
    tm = pad8(tile_m)
    est = 0
    est += 2 * tm * 128 * 4                 # s_a blocks (lane-padded to 128)
    est += 2 * 8 * tile_n * 4               # s_b blocks (sublane-padded to 8)
    est += 2 * tile_n * dp * ne_itemsize    # new_emb blocks
    est += 2 * tm * tile_n * 1              # int8 mask blocks
    est += 2 * tm * dp * 4                  # output blocks
    est += tm * dp * 4                      # acc scratch
    est += tm * 128 * 4                     # row_sum scratch (lane-padded)
    est += 3 * tm * tile_n * 4              # logits / e / w f32 temporaries
    return est


# --------------------------------------------------------------------------- #
# Wrapper
# --------------------------------------------------------------------------- #
def attention_aggregator(feature_a, feature_b, W, bias, a_param, mask, *,
                         tile_m=None, tile_n=None, matmul_dtype=jnp.float32):
    """Pallas forward.  W is the torch Linear weight [out, in]; a_param is
    [a_dim + b_dim, 1]; mask is the dense 0/1 adjacency (Na, Nb), int8 preferred."""
    Na, a_dim = feature_a.shape
    Nb, b_dim = feature_b.shape

    # ---- Grid-invariant precompute, hoisted to plain XLA (runs exactly once) ----
    new_emb = (feature_b @ W.T + bias.reshape(1, b_dim)).astype(jnp.float32)   # (Nb, b_dim)
    a1 = a_param[:a_dim]                                                        # (a_dim, 1)
    a2 = a_param[a_dim:]                                                        # (b_dim, 1)
    s_a = (feature_a @ a1).astype(jnp.float32)                                  # (Na, 1)
    s_b = (new_emb @ a2).reshape(1, Nb).astype(jnp.float32)                     # (1, Nb)

    # ---- Lane / K alignment: pad the feature dim (output lanes) and the b-node
    #      axis (contraction + elementwise lanes) to multiples of 128. ----
    Dp = ((b_dim + 127) // 128) * 128
    Nbp = ((Nb + 127) // 128) * 128
    use_ones_col = Dp > b_dim          # spare padded column -> row_sum on the MXU

    new_emb_p = jnp.zeros((Nbp, Dp), jnp.float32).at[:Nb, :b_dim].set(new_emb)
    if use_ones_col:
        new_emb_p = new_emb_p.at[:, b_dim].set(1.0)   # ones column (padded rows inert: w=0)
    new_emb_p = new_emb_p.astype(matmul_dtype)

    s_b_p = jnp.zeros((1, Nbp), jnp.float32).at[:, :Nb].set(s_b)

    mask_i8 = mask if mask.dtype == jnp.int8 else mask.astype(jnp.int8)
    mask_p = jnp.zeros((Na, Nbp), jnp.int8).at[:, :Nb].set(mask_i8)

    # ---- Tile selection ----
    vmem_cap = _vmem_capacity_bytes()
    if tile_m is None:
        max_tile_m = 512 if vmem_cap >= 96 * 1024 * 1024 else 256   # v5e/v6e vs v7x
        tile_m = _choose_tile_m(Na, max_tile_m)
    if tile_n is None:
        tile_n = _choose_tile_n(Nbp)
    assert Na % tile_m == 0, "pad node_num_a to a multiple of tile_m"
    assert tile_m % 8 == 0 or tile_m == Na
    assert Nbp % tile_n == 0 and tile_n % 128 == 0
    gm, gk = Na // tile_m, Nbp // tile_n

    # ---- Per-tile nonzero counts for empty-tile skipping (scalar prefetch) ----
    counts = (mask_p.astype(jnp.int32)
              .reshape(gm, tile_m, gk, tile_n).sum(axis=(1, 3))
              .reshape(-1).astype(jnp.int32))                       # (gm * gk,)

    # ---- VMEM budget: raise the scoped limit only when the (corrected) estimate
    #      needs it, capped at 0.8x the chip's physical VMEM. ----
    est = _vmem_estimate(tile_m, tile_n, Dp, jnp.dtype(matmul_dtype).itemsize)
    vmem_limit = None
    if est > 12 * 1024 * 1024:          # may exceed the smallest scoped default (v5e 16 MiB)
        vmem_limit = min(max(int(est * 1.25), 32 * 1024 * 1024), int(0.8 * vmem_cap))

    kernel = functools.partial(attention_agg_kernel,
                               b_dim=b_dim, use_ones_col=use_ones_col)

    out_p = pl.pallas_call(
        kernel,
        out_shape=jax.ShapeDtypeStruct((Na, Dp), jnp.float32),
        grid_spec=pltpu.PrefetchScalarGridSpec(
            num_scalar_prefetch=1,
            grid=(gm, gk),
            in_specs=[
                pl.BlockSpec((tile_m, 1),      lambda i, k, c: (i, 0)),   # s_a
                pl.BlockSpec((1, tile_n),      lambda i, k, c: (0, k)),   # s_b
                pl.BlockSpec((tile_n, Dp),     lambda i, k, c: (k, 0)),   # new_emb
                pl.BlockSpec((tile_m, tile_n), lambda i, k, c: (i, k)),   # int8 mask
            ],
            out_specs=pl.BlockSpec((tile_m, Dp), lambda i, k, c: (i, 0)),
            scratch_shapes=[pltpu.VMEM((tile_m, Dp), jnp.float32),
                            pltpu.VMEM((tile_m, 1), jnp.float32)],
        ),
        compiler_params=pltpu.CompilerParams(
            dimension_semantics=("parallel", "arbitrary"),
            vmem_limit_bytes=vmem_limit),
    )(counts, s_a, s_b_p, new_emb_p, mask_p)

    return out_p[:, :b_dim]


# --------------------------------------------------------------------------- #
# Plain-JAX reference (dense masked mirror of the torch forward)
# --------------------------------------------------------------------------- #
def reference(feature_a, feature_b, W, bias, a_param, mask_f32):
    a_dim = feature_a.shape[1]
    new_emb = feature_b @ W.T + bias
    logits = feature_a @ a_param[:a_dim] + (new_emb @ a_param[a_dim:]).T
    elu = jnp.where(logits > 0, logits, 0.1 * (jnp.exp(logits) - 1.0))
    w = jnp.exp(elu) * mask_f32
    row_sum = w.sum(-1, keepdims=True)
    row_sum = jnp.where(row_sum == 0.0, jnp.ones_like(row_sum), row_sum)
    return (w @ new_emb) / row_sum


# --------------------------------------------------------------------------- #
# Demo / self-test
# --------------------------------------------------------------------------- #
if __name__ == "__main__":
    def make_mask(num_a, num_b, edges_per_row, isolated_rows):
        # Deterministic edge_dic_list -> dense int8 adjacency mask.
        m = np.zeros((num_a, num_b), dtype=np.int8)
        for n in range(num_a):
            if n in isolated_rows:
                continue
            for k in range(edges_per_row):
                m[n, (3 * n + k) % num_b] = 1
        return jnp.asarray(m)

    def run_case(name, na, nb, a_dim, b_dim, isolated_rows, **kwargs):
        key = jax.random.PRNGKey(0)
        k_fa, k_fb, k_w, k_b, k_a = jax.random.split(key, 5)
        feature_a = jax.random.normal(k_fa, (na, a_dim), dtype=jnp.float32)
        feature_b = jax.random.normal(k_fb, (nb, b_dim), dtype=jnp.float32)
        # Parameter shapes from __init__: Linear(b_dim, b_dim) weight/bias, a: [a_dim+b_dim, 1].
        W = jax.random.normal(k_w, (b_dim, b_dim), dtype=jnp.float32) / jnp.sqrt(b_dim)
        bias = jax.random.normal(k_b, (b_dim,), dtype=jnp.float32) * 0.1
        a_param = jax.random.normal(k_a, (a_dim + b_dim, 1), dtype=jnp.float32) * 0.2
        mask = make_mask(na, nb, 3, isolated_rows)

        ref = reference(feature_a, feature_b, W, bias, a_param, mask.astype(jnp.float32))
        out = attention_aggregator(feature_a, feature_b, W, bias, a_param, mask, **kwargs)
        out = jax.block_until_ready(out)
        np.testing.assert_allclose(np.asarray(out), np.asarray(ref),
                                   rtol=2e-3, atol=2e-3, err_msg=name)

    # A) Default tiling: Nb=24 -> Nbp=128, tile_m=32 (2 row tiles for v7x 2-TC
    #    sharding), single k step, row_sum via the MXU ones column, node 5
    #    isolated (row_sum==0 -> 1 path).
    run_case("default", na=64, nb=24, a_dim=32, b_dim=48, isolated_rows={5})

    # B) Multi-k accumulation + empty-tile skipping: Nb=200 -> Nbp=256,
    #    tile_n=128 (2 k steps), tile_m=16; rows 16..31 fully isolated so one
    #    whole row tile is skipped on every k step.
    run_case("k_tiled", na=64, nb=200, a_dim=32, b_dim=48,
             isolated_rows=set(range(16, 32)) | {5}, tile_m=16, tile_n=128)

    # C) b_dim already lane-aligned (no spare ones column): XLU row-sum path.
    run_case("sum_path", na=32, nb=24, a_dim=16, b_dim=128, isolated_rows={3})

    print("KERNEL_OK")
</pallas_src>

<mosaic_0001>
module attributes {stable_mosaic.version = 11 : i64} {
  func.func @attention_agg_kernel(%arg0: i32, %arg1: i32, %arg2: memref<2xi32, #tpu.memory_space<smem>>, %arg3: memref<32x1xf32, #tpu.memory_space<vmem>>, %arg4: memref<1x128xf32, #tpu.memory_space<vmem>>, %arg5: memref<128x128xf32, #tpu.memory_space<vmem>>, %arg6: memref<32x128xi8, #tpu.memory_space<vmem>>, %arg7: memref<32x128xf32, #tpu.memory_space<vmem>>, %arg8: memref<32x128xf32, #tpu.memory_space<vmem>>, %arg9: memref<32x1xf32, #tpu.memory_space<vmem>>) attributes {dimension_semantics = [#tpu.dimension_semantics<parallel>, #tpu.dimension_semantics<arbitrary>], iteration_bounds = array<i64: 2, 1>, scalar_prefetch = 1 : i64, scratch_operands = 2 : i64, tpu.core_type = #tpu.core_type<tc>, window_params = [{transform_indices = @transform_0, window_bounds = array<i64: 32, 1>}, {transform_indices = @transform_1, window_bounds = array<i64: 1, 128>}, {transform_indices = @transform_2, window_bounds = array<i64: 128, 128>}, {transform_indices = @transform_3, window_bounds = array<i64: 32, 128>}, {transform_indices = @transform_4, window_bounds = array<i64: 32, 128>}]} {
    %c0_i32 = arith.constant 0 : i32
    %0 = arith.cmpi eq, %arg1, %c0_i32 : i32
    %1 = arith.extui %0 : i1 to i32
    %c0_i32_0 = arith.constant 0 : i32
    %2 = arith.cmpi ne, %1, %c0_i32_0 : i32
    scf.if %2 {
      %cst = arith.constant 0.000000e+00 : f32
      %13 = vector.broadcast %cst : f32 to vector<32x128xf32>
      %c0 = arith.constant 0 : index
      %c0_5 = arith.constant 0 : index
      %14 = vector.load %arg8[%c0, %c0_5] : memref<32x128xf32, #tpu.memory_space<vmem>>, vector<32x128xf32>
      tpu.vector_store %arg8[%c0, %c0_5], %13 {strides = array<i32>} : memref<32x128xf32, #tpu.memory_space<vmem>>, vector<32x128xf32>,
      %cst_6 = arith.constant 0.000000e+00 : f32
      %15 = vector.broadcast %cst_6 : f32 to vector<32x1xf32>
      %c0_7 = arith.constant 0 : index
      %c0_8 = arith.constant 0 : index
      %16 = vector.load %arg9[%c0_7, %c0_8] : memref<32x1xf32, #tpu.memory_space<vmem>>, vector<32x1xf32>
      tpu.vector_store %arg9[%c0_7, %c0_8], %15 {strides = array<i32>} : memref<32x1xf32, #tpu.memory_space<vmem>>, vector<32x1xf32>,
    } else {
    }
    %c1_i32 = arith.constant 1 : i32
    %3 = arith.muli %arg0, %c1_i32 : i32
    %4 = arith.addi %3, %arg1 : i32
    %5 = arith.index_cast %4 : i32 to index
    %6 = memref.load %arg2[%5] : memref<2xi32, #tpu.memory_space<smem>>
    %c0_i32_1 = arith.constant 0 : i32
    %7 = arith.cmpi sgt, %6, %c0_i32_1 : i32
    %8 = arith.extui %7 : i1 to i32
    %c0_i32_2 = arith.constant 0 : i32
    %9 = arith.cmpi ne, %8, %c0_i32_2 : i32
    scf.if %9 {
      %c0 = arith.constant 0 : index
      %c0_5 = arith.constant 0 : index
      %13 = vector.load %arg3[%c0, %c0_5] : memref<32x1xf32, #tpu.memory_space<vmem>>, vector<32x1xf32>
      %c0_6 = arith.constant 0 : index
      %c0_7 = arith.constant 0 : index
      %14 = vector.load %arg4[%c0_6, %c0_7] : memref<1x128xf32, #tpu.memory_space<vmem>>, vector<1x128xf32>
      %15 = vector.broadcast %13 : vector<32x1xf32> to vector<32x128xf32>
      %16 = vector.broadcast %14 : vector<1x128xf32> to vector<32x128xf32>
      %17 = arith.addf %15, %16 : vector<32x128xf32>
      %18 = math.exp %17 : vector<32x128xf32>
      %cst = arith.constant 0.000000e+00 : f32
      %19 = vector.broadcast %cst : f32 to vector<32x128xf32>
      %20 = arith.cmpf ogt, %17, %19 : vector<32x128xf32>
      %cst_8 = arith.constant 1.000000e+00 : f32
      %21 = vector.broadcast %cst_8 : f32 to vector<32x128xf32>
      %22 = arith.subf %18, %21 : vector<32x128xf32>
      %cst_9 = arith.constant 1.000000e-01 : f32
      %23 = vector.broadcast %cst_9 : f32 to vector<32x128xf32>
      %24 = arith.mulf %23, %22 : vector<32x128xf32>
      %25 = math.exp %24 : vector<32x128xf32>
      %26 = arith.select %20, %18, %25 : vector<32x128xi1>, vector<32x128xf32>
      %c0_10 = arith.constant 0 : index
      %c0_11 = arith.constant 0 : index
      %27 = vector.load %arg6[%c0_10, %c0_11] : memref<32x128xi8, #tpu.memory_space<vmem>>, vector<32x128xi8>
      %c0_i8 = arith.constant 0 : i8
      %28 = vector.broadcast %c0_i8 : i8 to vector<32x128xi8>
      %29 = arith.cmpi ne, %27, %28 : vector<32x128xi8>
      %cst_12 = arith.constant 0.000000e+00 : f32
      %30 = vector.broadcast %cst_12 : f32 to vector<32x128xf32>
      %31 = arith.select %29, %26, %30 : vector<32x128xi1>, vector<32x128xf32>
      %c0_13 = arith.constant 0 : index
      %c0_14 = arith.constant 0 : index
      %32 = vector.load %arg8[%c0_13, %c0_14] : memref<32x128xf32, #tpu.memory_space<vmem>>, vector<32x128xf32>
      %c0_15 = arith.constant 0 : index
      %c0_16 = arith.constant 0 : index
      %33 = vector.load %arg5[%c0_15, %c0_16] : memref<128x128xf32, #tpu.memory_space<vmem>>, vector<128x128xf32>
      %cst_17 = arith.constant dense<0.000000e+00> : vector<32x128xf32>
      %34 = tpu.matmul %31, %33, %cst_17 {dimension_numbers = #tpu.dot_dimension_numbers<[1], [0], [0], [1], [0, 0, 1, 1], [], []>} : vector<32x128xf32>, vector<128x128xf32>, vector<32x128xf32> -> vector<32x128xf32>
      %35 = arith.addf %32, %34 : vector<32x128xf32>
      %c0_18 = arith.constant 0 : index
      %c0_19 = arith.constant 0 : index
      %36 = vector.load %arg8[%c0_18, %c0_19] : memref<32x128xf32, #tpu.memory_space<vmem>>, vector<32x128xf32>
      tpu.vector_store %arg8[%c0_18, %c0_19], %35 {strides = array<i32>} : memref<32x128xf32, #tpu.memory_space<vmem>>, vector<32x128xf32>,
    } else {
    }
    %c0_i32_3 = arith.constant 0 : i32
    %10 = arith.cmpi eq, %arg1, %c0_i32_3 : i32
    %11 = arith.extui %10 : i1 to i32
    %c0_i32_4 = arith.constant 0 : i32
    %12 = arith.cmpi ne, %11, %c0_i32_4 : i32
    scf.if %12 {
      %c0 = arith.constant 0 : index
      %c0_5 = arith.constant 0 : index
      %13 = vector.load %arg8[%c0, %c0_5] : memref<32x128xf32, #tpu.memory_space<vmem>>, vector<32x128xf32>
      %14 = vector.extract_strided_slice %13 {offsets = [0, 48], sizes = [32, 1], strides = [1, 1]} : vector<32x128xf32> to vector<32x1xf32>
      %cst = arith.constant 0.000000e+00 : f32
      %15 = vector.broadcast %cst : f32 to vector<32x1xf32>
      %16 = arith.cmpf oeq, %14, %15 : vector<32x1xf32>
      %cst_6 = arith.constant 1.000000e+00 : f32
      %17 = vector.broadcast %cst_6 : f32 to vector<32x1xf32>
      %18 = arith.select %16, %17, %14 : vector<32x1xi1>, vector<32x1xf32>
      %19 = vector.broadcast %18 : vector<32x1xf32> to vector<32x128xf32>
      %20 = arith.divf %13, %19 : vector<32x128xf32>
      %c0_7 = arith.constant 0 : index
      %c0_8 = arith.constant 0 : index
      %21 = vector.load %arg7[%c0_7, %c0_8] : memref<32x128xf32, #tpu.memory_space<vmem>>, vector<32x128xf32>
      tpu.vector_store %arg7[%c0_7, %c0_8], %20 {strides = array<i32>} : memref<32x128xf32, #tpu.memory_space<vmem>>, vector<32x128xf32>,
    } else {
    }
    return
  }
  func.func @transform_0(%arg0: i32, %arg1: i32, %arg2: memref<2xi32, #tpu.memory_space<smem>>) -> (i32, i32) {
    %c0_i32 = arith.constant 0 : i32
    %c0_i32_0 = arith.constant 0 : i32
    return %arg0, %c0_i32 : i32, i32
  }
  func.func @transform_1(%arg0: i32, %arg1: i32, %arg2: memref<2xi32, #tpu.memory_space<smem>>) -> (i32, i32) {
    %c0_i32 = arith.constant 0 : i32
    %c0_i32_0 = arith.constant 0 : i32
    return %c0_i32, %arg1 : i32, i32
  }
  func.func @transform_2(%arg0: i32, %arg1: i32, %arg2: memref<2xi32, #tpu.memory_space<smem>>) -> (i32, i32) {
    %c0_i32 = arith.constant 0 : i32
    %c0_i32_0 = arith.constant 0 : i32
    return %arg1, %c0_i32 : i32, i32
  }
  func.func @transform_3(%arg0: i32, %arg1: i32, %arg2: memref<2xi32, #tpu.memory_space<smem>>) -> (i32, i32) {
    %c0_i32 = arith.constant 0 : i32
    return %arg0, %arg1 : i32, i32
  }
  func.func @transform_4(%arg0: i32, %arg1: i32, %arg2: memref<2xi32, #tpu.memory_space<smem>>) -> (i32, i32) {
    %c0_i32 = arith.constant 0 : i32
    %c0_i32_0 = arith.constant 0 : i32
    return %arg0, %c0_i32 : i32, i32
  }
}

</mosaic_0001>

<bundles_post_ra>
// kernel: tpu_custom_call.1
= control target key start
LH: loop header
LB: loop body
LE: loop exit
PB: predicated region body
PF: predicated region fallthrough
CT: control target
= control target key end

     0   :  { %s1295_s0 = inlined_call_operand.vmem [shape: s32[2], index: 0, kind: input, shape index: {}]   ;;  %s1296_s1 = inlined_call_operand.vmem [shape: f32[64,1], index: 1, kind: input, shape index: {}]   ;;  %s1297_s2 = inlined_call_operand.vmem [shape: f32[1,128], index: 2, kind: input, shape index: {}]   ;;  %s1298_s3 = inlined_call_operand.hbm [shape: f32[128,128], index: 3, kind: input, shape index: {}]   ;;  %s1299_s4 = inlined_call_operand.vmem [shape: s8[64,128], index: 4, kind: input, shape index: {}]   ;;  %s1300_s5 = inlined_call_operand.hbm [shape: f32[64,128], index: 5, kind: output, shape index: {}]  }
   0x1   :  { %s10_s20 = sshll.u32 %s1295_s0, 4  ;;  %s11_s20 = int_to_ptr.vmem [resolvable:$true] %s10_s20 }
   0x2   :  { %s928_s21 = scalar_lea.vmem %s11_s20, 16  ;;  %p933_p1 = scmp.lt.s32.totalorder %s11_s20, %s11_s20 }
   0x3   :  { %p929_p0 = scmp.ne.s32.totalorder %s11_s20, %s928_s21  ;;  %p934_p2 = scmp.lt.s32.totalorder %s928_s21, %s928_s21 }
   0x5   :  { %p935_p3 = por %p934_p2, %p933_p1 }
   0x7   :  { %p936_p4 = pnand %p935_p3, %p929_p0 }
   0x9   :  { %939 = shalt.err (!%p936_p4)  }
   0xa   :  { %s1054_s22 = smov [#allocation5]  }
   0xb   :  { %13 = dma.vmem_to_smem %s11_s20, 16, %s1054_s22, [#allocation4] }
   0xc   :  { %1020 = dma.done.wait [#allocation4], 16 }
   0xd   :  { %1021 = vsyncadd [#allocation4], 4294967280 }
   0xe   :  { %15 = sfence }
   0xf   :  { %16 = vsyncpa [#allocation7], 0 }
  0x10   :  { %17 = vsyncpa [#allocation8], 0 }
  0x11   :  { %19 = vsyncpa [#allocation8 + $0x1], 0  ;;  %s1097_s23 = smov 0   ;;  %s1099_s24 = smov 0  }
  0x12   :  { %s1101_s0 = smov 0   ;;  %s1103_s25 = smov 0  }
  0x13   :  { %s1105_s26 = smov 0   ;;  %s1107_s27 = smov 0  }
  0x14 LB: > { %s692_s28 = sadd.s32 4294967295, %s1052_s27   ;;  %s693_s29 = sadd.s32 4294967294, %s1052_s27   ;;  %s1052_s27 = sphi %s1107_s27, %s25_s27   ;;  %s1048_s26 = sphi %s1105_s26, %s1318_s26   ;;  %s1044_s25 = sphi %s1103_s25, %s1317_s25   ;;  %s1040_s0 = sphi %s1101_s0, %s1316_s0   ;;  %s1036_s24 = sphi %s1099_s24, %s1315_s24   ;;  %s1032_s23 = sphi %s1097_s23, %s1314_s23  }
  0x15   : > { %s37_s30 = sadd.s32 1, %s1048_s26  ;;  %s150_s6 = sadd.s32 1, %s1040_s0 }
  0x16   : > { %p39_p5 = scmp.ge.s32.totalorder %s37_s30, 2  ;;  %p160_p6 = scmp.ne.s32.totalorder %s1040_s0, %s1036_s24 }
  0x17   : > { %p161_p7 = scmp.eq.s32.totalorder %s692_s28, 1  ;;  %p166_p8 = scmp.ne.s32.totalorder %s1036_s24, %s1032_s23 }
  0x18   : > { %s1320_s30 = smov (%p39_p5, %s37_s30), 0  ;;  %p167_p10 = scmp.eq.s32.totalorder %s693_s29, 1 }
  0x19   : > { %p1137_p9 = por %p161_p7, %p160_p6  ;;  %s147_s8 = ssub.s32 %s1048_s26, %s1320_s30 }
  0x1a   : > { %p694_p11 = scmp.ge.s32.totalorder %s1052_s27, 1  ;;  %p148_p12 = scmp.eq.s32.totalorder %s147_s8, 0 }
  0x1b   : > { %s1305_s7 = scalar_select %p1137_p9, 1, 0 }
  0x1c   : > { %p1144_p13 = por %p167_p10, %p166_p8  ;;  %p174_p0 = scmp.lt.s32.totalorder %s1052_s27, 3 }
  0x1d   : > { %s1150_s10 = scalar_select %p148_p12, %s1040_s0, %s150_s6  }
  0x1e   : > { %s1306_s9 = scalar_select %p1144_p13, 1, 0 }
  0x1f   : > { %p1152_p1 = pnand %p694_p11, %p174_p0  ;;  %p1156_p2 = scmp.eq.s32.totalorder %s692_s28, 0 }
  0x20   : > { %s1055_s13 = smov [#allocation6]   ;;  %s940_s18 = scalar_lea.hbm %s1298_s3, 2048 }
  0x21   : > { %s1307_s11 = scalar_select %p1152_p1, 1, 0 }
  0x22   : > { %s1308_s12 = scalar_select %p1156_p2, 1, 0 }
  0x23   : > { %p832_p3 = pneg %p1152_p1  ;;  %s195_s14 = sshll.u32 %s1055_s13, 4  ;;  %s196_s14 = int_to_ptr.vmem [resolvable:$true] %s195_s14 }
  0x24   : > { %p941_p5 = scmp.ne.s32.totalorder %s1298_s3, %s940_s18  ;;  %p947_p10 = scmp.lt.u32.totalorder %s940_s18, %s1298_s3 }
  0x25   : > { %p1164_p4 = pnand %p1156_p2, %p832_p3 }
  0x27   : > { %p942_p6 = pneg %p1164_p4 }
  0x29   : > { %p943_p7 = pnand %p942_p6, %p941_p5 }
  0x2b   : > { %p944_p8 = pneg %p943_p7 }
  0x2d   : > { %p949_p11 = pnand %p947_p10, %p944_p8 }
  0x2f   : > { %952 = shalt.err (!%p949_p11)
}
  0x30   : > { %s953_s28 = scalar_lea.vmem %s196_s14, 2048  ;;  %p961_p13 = scmp.lt.s32.totalorder %s196_s14, %s196_s14 }
  0x31   : > { %p954_p12 = scmp.ne.s32.totalorder %s196_s14, %s953_s28  ;;  %p962_p9 = scmp.lt.s32.totalorder %s953_s28, %s953_s28 }
  0x33   : > { %p956_p0 = pnand %p954_p12, %p942_p6  ;;  %p963_p2 = por %p962_p9, %p961_p13 }
  0x35   : > { %p957_p3 = pneg %p956_p0 }
  0x37   : > { %p964_p1 = pnand %p963_p2, %p957_p3 }
  0x39   : > { %967 = shalt.err (!%p964_p1)
}
  0x3a   : > { %s1056_s29 = smov 128   ;;  %s1057_s6 = smov 8  }
  0x3b   : > { %835 = dma.hbm_to_vmem [thread:$0]  (!%p1164_p4), %s1298_s3, 2048, %s196_s14, [#allocation7], %s1056_s29, %s1056_s29, %s1057_s6  }
  0x3c   : > { %p1310_p5 = scmp.ne.s32.totalorder %s1307_s11, 0 }
  0x3d   : > { %p1311_p7 = scmp.ne.s32.totalorder (!%p1310_p5), %s1308_s12, 0 }
  0x3e   : > { %230 = sbr.rel (%p1310_p5) target bundleno = 634 (0x27a), region = 36 }
  0x45   : > { %1023 = dma.done.wait (%p1311_p7), [#allocation7], 2048  }
  0x46   : > { %1025 = vsyncadd (%p1311_p7), [#allocation7], 4294965248  ;;  %s263_s15 = sand.u32 1, %s1036_s24   ;;  %s701_s16 = sshll.u32 %s1044_s25, 2  ;;  %v1058_v0 = vmov 0.0  }
  0x47   : > { %s300_s17 = sld [smem:[#allocation5 + %s1044_s25]]  ;;  %s700_s14 = sshll.u32 %s263_s15, 5  ;;  %290 = vst [vmem:[#allocation2] sm:$0xff] %v1058_v0  ;;  %291 = vst [vmem:[#allocation2 + $0x8] sm:$0xff] %v1058_v0 }
  0x48   : > { %292 = vst [vmem:[#allocation2 + $0x10] sm:$0xff] %v1058_v0  ;;  %293 = vst [vmem:[#allocation2 + $0x18] sm:$0xff] %v1058_v0  ;;  %p267_p9 = scmp.lt.s32.totalorder %s701_s16, 7  ;;  %p276_p13 = scmp.lt.s32.totalorder %s1044_s25, 1 }
  0x49   : > { %s1205_s6 = scalar_lea.vmem [#allocation9], %s700_s14 }
  0x4a   : > { %s1322_s16 = smov (!%p267_p9, %s701_s16), 7 }
  0x4b   : > { %s277_s11 = scalar_select %p276_p13, %s1044_s25, 1 }
  0x4c   : > { %s702_s12 = sshll.u32 %s1322_s16, 3 }
  0x4d   : > { %s270_s20 = scalar_lea.vmem %s1296_s1, %s702_s12  ;;  %s703_s21 = sshll.u32 %s277_s11, 3 }
  0x4e   : > { %s1203_s29 = scalar_lea.vmem %s1299_s4, %s703_s21  ;;  %p704_p1 = scmp.le.s32.totalorder %s300_s17, 0 }
  0x4f   : > { %v306_v1 = vld [vmem:[%s270_s20 + $0x8] sm:$0xff] (!%p704_p1)  ;;  %v305_v2 = vld [vmem:[%s270_s20] sm:$0xff] (!%p704_p1)  ;;  %v1059_v3 = vmov (!%p704_p1), 0   ;;  %v308_v6 = vld [vmem:[%s270_s20 + $0x18] sm:$0xff] (!%p704_p1) }
  0x50   : > { %304 = sbr.rel (%p704_p1) target bundleno = 464 (0x1d0), region = 48  ;;  %901 = vset.pattern.permute.xlu1 (!%p704_p1), %v1059_v3  ;;  %900 = vset.pattern.permute.xlu0 (!%p704_p1), %v1059_v3  ;;  %v411_v4 = vld [vmem:[#allocation6] sm:$0xff] (!%p704_p1)  ;;  %v412_v5 = vld [vmem:[#allocation6 + $0x8] sm:$0xff] (!%p704_p1)  ;;  %v307_v7 = vld [vmem:[%s270_s20 + $0x10] sm:$0xff] (!%p704_p1) }
  0x51   : > { %317 = vperm.xlu1 (!%p704_p1), %901, %v306_v1   ;;  %312 = vperm.xlu0 (!%p704_p1), %900, %v305_v2   ;;  %v778_v8 = vpack.c.bf16 (!%p704_p1), %v412_v5, %v411_v4  ;;  %v413_v9 = vld [vmem:[#allocation6 + $0x10] sm:$0xff] (!%p704_p1)  ;;  %v414_v10 = vld [vmem:[#allocation6 + $0x18] sm:$0xff] (!%p704_p1)  ;;  %v415_v12 = vld [vmem:[#allocation6 + $0x20] sm:$0xff] (!%p704_p1) }
  0x52   : > { %v782_v11 = vpack.c.bf16 (!%p704_p1), %v414_v10, %v413_v9  ;;  %v416_v13 = vld [vmem:[#allocation6 + $0x28] sm:$0xff] (!%p704_p1)  ;;  %v417_v15 = vld [vmem:[#allocation6 + $0x30] sm:$0xff] (!%p704_p1)  ;;  %v418_v16 = vld [vmem:[#allocation6 + $0x38] sm:$0xff] (!%p704_p1) }
  0x53   : > { %779 = vmatprep.subr.bf16.mxu0 (!%p704_p1), %v778_v8  ;;  %810 = vmatprep.subr.bf16.mxu1 (!%p704_p1), %v778_v8  ;;  %v786_v14 = vpack.c.bf16 (!%p704_p1), %v416_v13, %v415_v12  ;;  %v790_v17 = vpack.c.bf16 (!%p704_p1), %v418_v16, %v417_v15  ;;  %v419_v18 = vld [vmem:[#allocation6 + $0x40] sm:$0xff] (!%p704_p1)  ;;  %v420_v19 = vld [vmem:[#allocation6 + $0x48] sm:$0xff] (!%p704_p1)  ;;  %v421_v21 = vld [vmem:[#allocation6 + $0x50] sm:$0xff] (!%p704_p1) }
  0x54   : > { %781 = vmatpush3.bf16.msra.mxu0 (!%p704_p1), %v778_v8  ;;  %818 = vmatpush3.bf16.msra.mxu1 (!%p704_p1), %v778_v8  ;;  %v794_v20 = vpack.c.bf16 (!%p704_p1), %v420_v19, %v419_v18  ;;  %v422_v22 = vld [vmem:[#allocation6 + $0x58] sm:$0xff] (!%p704_p1)  ;;  %v423_v24 = vld [vmem:[#allocation6 + $0x60] sm:$0xff] (!%p704_p1)  ;;  %v424_v25 = vld [vmem:[#allocation6 + $0x68] sm:$0xff] (!%p704_p1) }
  0x55   : > { %327 = vperm.xlu1 (!%p704_p1), %901, %v308_v6   ;;  %322 = vperm.xlu0 (!%p704_p1), %900, %v307_v7   ;;  %v798_v23 = vpack.c.bf16 (!%p704_p1), %v422_v22, %v421_v21  ;;  %v802_v26 = vpack.c.bf16 (!%p704_p1), %v424_v25, %v423_v24  ;;  %v425_v27 = vld [vmem:[#allocation6 + $0x70] sm:$0xff] (!%p704_p1)  ;;  %v426_v28 = vld [vmem:[#allocation6 + $0x78] sm:$0xff] (!%p704_p1)  ;;  %v705_v30 = vld [vmem:[%s1297_s2] ss:$0 sm:$0xff] (!%p704_p1) }
  0x56   : > { %783 = vmatprep.subr.bf16.mxu0 (!%p704_p1), %v782_v11  ;;  %811 = vmatprep.subr.bf16.mxu1 (!%p704_p1), %v782_v11  ;;  %v806_v29 = vpack.c.bf16 (!%p704_p1), %v426_v28, %v425_v27  ;;  %v372_v35 = vld [vmem:[%s1203_s29] sm:$0xff] (!%p704_p1)  ;;  %v408_v25 = vld [vmem:[#allocation2 + $0x8] sm:$0xff] (!%p704_p1) }
  0x57   : > { %vm373_vm0 = vnez %v372_v35 }
  0x58   : > { %785 = vmatpush3.bf16.msra.mxu0 %v782_v11  ;;  %819 = vmatpush3.bf16.msra.mxu1 %v782_v11  ;;  %v374_v44 = vsel %vm373_vm0, 16843009, %v1059_v3 }
  0x59   : > { %787 = vmatprep.subr.bf16.mxu0 %v786_v14  ;;  %812 = vmatprep.subr.bf16.mxu1 %v786_v14  ;;  %v375_v45 = vunpack.c.0.s8 %v374_v44  ;;  %v376_v46 = vunpack.c.1.s8 %v374_v44  ;;  %v377_v48 = vunpack.c.2.s8 %v374_v44  ;;  %v378_v51 = vunpack.c.3.s8 %v374_v44 }
  0x5b   : > { %v379_v47 = vpack.c.b16 %v375_v45, %v375_v45  ;;  %v381_v50 = vpack.c.b16 %v376_v46, %v376_v46  ;;  %v383_v57 = vpack.c.b16 %v377_v48, %v377_v48  ;;  %v385_v61 = vpack.c.b16 %v378_v51, %v378_v51 }
  0x5c   : > { %789 = vmatpush3.bf16.msra.mxu0 %v786_v14  ;;  %820 = vmatpush3.bf16.msra.mxu1 %v786_v14 }
  0x5d   : > { %791 = vmatprep.subr.bf16.mxu0 %v790_v17  ;;  %813 = vmatprep.subr.bf16.mxu1 %v790_v17  ;;  %v380_v56 = vpack.c.b8 %v379_v47, %v379_v47  ;;  %v382_v60 = vpack.c.b8 %v381_v50, %v381_v50  ;;  %v384_v5 = vpack.c.b8 %v383_v57, %v383_v57 }
  0x5e   : > { %v386_v7 = vpack.c.b8 %v385_v61, %v385_v61 }
  0x5f   : > { %vm387_vm1 = vnez %v380_v56  ;;  %vm388_vm2 = vnez %v382_v60  ;;  %vm389_vm3 = vnez %v384_v5 }
  0x60   : > { %793 = vmatpush3.bf16.msra.mxu0 %v790_v17  ;;  %821 = vmatpush3.bf16.msra.mxu1 %v790_v17  ;;  %v391_v10 = vsel %vm387_vm1, 16843009, %v1059_v3  ;;  %v392_v11 = vsel %vm388_vm2, 16843009, %v1059_v3  ;;  %vm390_vm4 = vnez %v386_v7  ;;  %v393_v14 = vsel %vm389_vm3, 16843009, %v1059_v3 }
  0x61   : > { %795 = vmatprep.subr.bf16.mxu0 %v794_v20  ;;  %814 = vmatprep.subr.bf16.mxu1 %v794_v20  ;;  %v395_v12 = vunpack.c.0.s8 %v391_v10  ;;  %v396_v13 = vunpack.c.0.s8 %v392_v11  ;;  %v394_v15 = vsel %vm390_vm4, 16843009, %v1059_v3  ;;  %v397_v17 = vunpack.c.0.s8 %v393_v14 }
  0x63   : > { %vm399_vm6 = vcmp.ne.s32.totalorder %v395_v12, 0  ;;  %vm400_vm8 = vcmp.ne.s32.totalorder %v396_v13, 0  ;;  %vm401_vm10 = vcmp.ne.s32.totalorder %v397_v17, 0 }
  0x64   : > { %797 = vmatpush3.bf16.msra.mxu0 %v794_v20  ;;  %822 = vmatpush3.bf16.msra.mxu1 %v794_v20  ;;  %v398_v20 = vunpack.c.0.s8 %v394_v15 }
  0x65   : > { %799 = vmatprep.subr.bf16.mxu0 %v798_v23  ;;  %815 = vmatprep.subr.bf16.mxu1 %v798_v23 }
  0x66   : > { %vm402_vm12 = vcmp.ne.s32.totalorder %v398_v20, 0 }
  0x68   : > { %801 = vmatpush3.bf16.msra.mxu0 %v798_v23  ;;  %823 = vmatpush3.bf16.msra.mxu1 %v798_v23 }
  0x69   : > { %803 = vmatprep.subr.bf16.mxu0 %v802_v26  ;;  %816 = vmatprep.subr.bf16.mxu1 %v802_v26 }
  0x6c   : > { %805 = vmatpush3.bf16.msra.mxu0 %v802_v26  ;;  %824 = vmatpush3.bf16.msra.mxu1 %v802_v26  ;;  %v407_v26 = vld [vmem:[#allocation2] sm:$0xff] }
  0x6d   : > { %807 = vmatprep.subr.bf16.mxu0 %v806_v29  ;;  %817 = vmatprep.subr.bf16.mxu1 %v806_v29 }
  0x70   : > { %809 = vmatpush3.bf16.msra.mxu0 %v806_v29  ;;  %825 = vmatpush3.bf16.msra.mxu1 %v806_v29 }
  0xd0   : > { %v318_v31 = vpop.permute.xlu1 %317  ;;  %v313_v32 = vpop.permute.xlu0 %312 }
  0xd1   : > { %v1212_v33 = vadd.f32 %v705_v30, %v318_v31  ;;  %v1214_v34 = vadd.f32 %v705_v30, %v313_v32  ;;  %v410_v31 = vld [vmem:[#allocation2 + $0x18] sm:$0xff]  ;;  %v409_v32 = vld [vmem:[#allocation2 + $0x10] sm:$0xff] }
  0xd3   : > { %v342_v36 = vmul.f32 1.442695, %v1212_v33  ;;  %v340_v37 = vmul.f32 1.442695, %v1214_v34  ;;  %vm349_vm5 = vcmp.gt.f32.partialorder %v1212_v33, 0.0  ;;  %vm348_vm7 = vcmp.gt.f32.partialorder %v1214_v34, 0.0 }
  0xd4   : > { %v328_v38 = vpop.permute.xlu1 %327  ;;  %v323_v39 = vpop.permute.xlu0 %322 }
  0xd5   : > { %902 = vpow2.f32 %v342_v36  ;;  %v1219_v40 = vadd.f32 %v705_v30, %v328_v38  ;;  %v1221_v41 = vadd.f32 %v705_v30, %v323_v39 }
  0xd6   : > { %904 = vpow2.f32 %v340_v37 }
  0xd7   : > { %v346_v42 = vmul.f32 1.442695, %v1219_v40  ;;  %v344_v43 = vmul.f32 1.442695, %v1221_v41  ;;  %vm351_vm9 = vcmp.gt.f32.partialorder %v1219_v40, 0.0  ;;  %vm350_vm11 = vcmp.gt.f32.partialorder %v1221_v41, 0.0 }
  0xd9   : > { %906 = vpow2.f32 %v346_v42 }
  0xda   : > { %908 = vpow2.f32 %v344_v43 }
  0xdf   : > { %v903_v49 = vpop.eup %902 }
  0xe0   : > { %v905_v52 = vpop.eup %904  ;;  %v707_v53 = vadd.f32 -1.0, %v903_v49 }
  0xe1   : > { %v706_v54 = vadd.f32 -1.0, %v905_v52 }
  0xe2   : > { %v357_v55 = vmul.f32 0.1, %v707_v53 }
  0xe3   : > { %v907_v58 = vpop.eup %906  ;;  %v356_v59 = vmul.f32 0.1, %v706_v54 }
  0xe4   : > { %v909_v62 = vpop.eup %908  ;;  %v362_v63 = vmul.f32 1.442695, %v357_v55  ;;  %v709_v0 = vadd.f32 -1.0, %v907_v58 }
  0xe5   : > { %v360_v1 = vmul.f32 1.442695, %v356_v59  ;;  %v708_v2 = vadd.f32 -1.0, %v909_v62 }
  0xe6   : > { %910 = vpow2.f32 %v362_v63  ;;  %v359_v4 = vmul.f32 0.1, %v709_v0 }
  0xe7   : > { %912 = vpow2.f32 %v360_v1  ;;  %v358_v6 = vmul.f32 0.1, %v708_v2 }
  0xe8   : > { %v366_v8 = vmul.f32 1.442695, %v359_v4 }
  0xe9   : > { %v364_v9 = vmul.f32 1.442695, %v358_v6 }
  0xea   : > { %914 = vpow2.f32 %v366_v8 }
  0xeb   : > { %916 = vpow2.f32 %v364_v9 }
  0xf0   : > { %v911_v16 = vpop.eup %910 }
  0xf1   : > { %v913_v18 = vpop.eup %912  ;;  %v369_v19 = vsel %vm349_vm5, %v903_v49, %v911_v16 }
  0xf2   : > { %v368_v21 = vsel %vm348_vm7, %v905_v52, %v913_v18 }
  0xf3   : > { %772 = vmatprep.mubr.msk.f32.mxu0 %vm399_vm6, %v368_v21 }
  0xf4   : > { %v915_v22 = vpop.eup %914  ;;  %773 = vmatmul.mubr.msk.f32.vlgmr.msra.gmra.mrb[0].mxu0 %vm400_vm8, %v369_v19 }
  0xf5   : > { %v917_v23 = vpop.eup %916  ;;  %v371_v3 = vsel %vm351_vm9, %v907_v58, %v915_v22 }
  0xf6   : > { %v370_v24 = vsel %vm350_vm11, %v909_v62, %v917_v23 }
  0xf7   : > { %775 = vmatprep.mubr.msk.f32.mxu1 %vm401_vm10, %v370_v24 }
  0xf8   : > { %776 = vmatmul.mubr.msk.f32.vlgmr.msra.gmra.mrb[0].mxu1 %vm402_vm12, %v371_v3 }
 0x1c7   : > { %v774_v27 = vpop.f32.mrb[0].mxu0 }
 0x1c8   : > { %v513_v28 = vadd.f32 %v774_v27, %v408_v25  ;;  %v493_v29 = vpop.f32.mrb[1].mxu0 }
 0x1c9   : > { %v512_v30 = vadd.f32 %v493_v29, %v407_v26 }
 0x1ca   : > { %517 = vst [vmem:[#allocation2 + $0x8] sm:$0xff] %v513_v28 }
 0x1cb   : > { %516 = vst [vmem:[#allocation2] sm:$0xff] %v512_v30  ;;  %v777_v33 = vpop.f32.mrb[0].mxu1 }
 0x1cc   : > { %v515_v34 = vadd.f32 %v777_v33, %v410_v31  ;;  %v503_v35 = vpop.f32.mrb[1].mxu1 }
 0x1cd   : > { %v514_v36 = vadd.f32 %v503_v35, %v409_v32 }
 0x1ce   : > { %519 = vst [vmem:[#allocation2 + $0x18] sm:$0xff] %v515_v34 }
 0x1cf   : > { %518 = vst [vmem:[#allocation2 + $0x10] sm:$0xff] %v514_v36 }
 0x1d0 PF: > { %v1060_v40 = vmov 48   ;;  %s719_s16 = sshll.u32 %s1044_s25, 9  ;;  %s581_s17 = sshll.u32 %s1205_s6, 4  ;;  %s1243_s17 = int_to_ptr.vmem [resolvable:$true] %s581_s17 }
 0x1d1   : > { %919 = vset.pattern.permute.xlu1 %v1060_v40  ;;  %918 = vset.pattern.permute.xlu0 %v1060_v40  ;;  %v524_v41 = vld [vmem:[#allocation2 + $0x8] sm:$0xff]  ;;  %s1241_s12 = scalar_lea.hbm %s1300_s5, %s719_s16  ;;  %s1249_s25 = scalar_lea.sflag [#allocation8], %s263_s15 }
 0x1d2   : > { %v523_v38 = vld [vmem:[#allocation2] sm:$0xff]  ;;  %vm528_vm0 = vcmp.eq.f32.partialorder %v524_v41, 0.0  ;;  %s968_s18 = scalar_lea.vmem %s1243_s17, 512  ;;  %p1312_p4 = scmp.ne.s32.totalorder %s1305_s7, 0 }
 0x1d3   : > { %vm527_vm14 = vcmp.eq.f32.partialorder %v523_v38, 0.0  ;;  %v532_v45 = vsel %vm528_vm0, 1.0, %v524_v41  ;;  %p969_p2 = scmp.ne.s32.totalorder %s1243_s17, %s968_s18  ;;  %s1061_s19 = smov [#allocation9]  }
 0x1d4   : > { %v531_v43 = vsel %vm527_vm14, 1.0, %v523_v38  ;;  %s972_s20 = sshll.u32 %s1061_s19, 4  ;;  %s973_s20 = int_to_ptr.vmem [resolvable:$false] %s972_s20 }
 0x1d5   : > { %v526_v39 = vld [vmem:[#allocation2 + $0x18] sm:$0xff]  ;;  %537 = vperm.xlu0 %918, %v531_v43   ;;  %p970_p6 = pnand %p969_p2, %p1312_p4  ;;  %s974_s21 = scalar_lea.vmem %s973_s20, 1024 }
 0x1d6   : > { %v525_v37 = vld [vmem:[#allocation2 + $0x10] sm:$0xff]  ;;  %vm530_vm15 = vcmp.eq.f32.partialorder %v526_v39, 0.0  ;;  %p975_p10 = scmp.lt.s32.totalorder %s1243_s17, %s973_s20  ;;  %p976_p11 = scmp.lt.s32.totalorder %s974_s21, %s968_s18 }
 0x1d7   : > { %vm529_vm13 = vcmp.eq.f32.partialorder %v525_v37, 0.0  ;;  %v534_v44 = vsel %vm530_vm15, 1.0, %v526_v39  ;;  %p971_p8 = pneg %p970_p6 }
 0x1d8   : > { %v533_v42 = vsel %vm529_vm13, 1.0, %v525_v37  ;;  %p977_p12 = por %p976_p11, %p975_p10 }
 0x1d9   : > { %547 = vperm.xlu1 %919, %v533_v42   ;;  %542 = vperm.xlu0 %918, %v532_v45  }
 0x1da   : > { %p978_p0 = pnand %p977_p12, %p971_p8 }
 0x1dd   : > { %552 = vperm.xlu1 %919, %v534_v44  }
 0x254   : > { %v538_v47 = vpop.permute.xlu0 %537 }
 0x258   : > { %v548_v46 = vpop.permute.xlu1 %547  ;;  %v543_v49 = vpop.permute.xlu0 %542 }
 0x259   : > { %920 = vrcp.f32 %v548_v46 }
 0x25a   : > { %922 = vrcp.f32 %v538_v47 }
 0x25c   : > { %v553_v48 = vpop.permute.xlu1 %552 }
 0x25d   : > { %924 = vrcp.f32 %v553_v48 }
 0x25e   : > { %926 = vrcp.f32 %v543_v49 }
 0x263   : > { %v921_v50 = vpop.eup %920 }
 0x264   : > { %v923_v51 = vpop.eup %922  ;;  %v560_v52 = vmul.f32 %v921_v50, %v525_v37 }
 0x265   : > { %v556_v53 = vmul.f32 %v923_v51, %v523_v38 }
 0x266   : > { %565 = vst [vmem:[%s1205_s6 + $0x10] sm:$0xff] %v560_v52 }
 0x267   : > { %v925_v54 = vpop.eup %924  ;;  %563 = vst [vmem:[%s1205_s6] sm:$0xff] %v556_v53 }
 0x268   : > { %v927_v55 = vpop.eup %926  ;;  %v562_v56 = vmul.f32 %v925_v54, %v526_v39 }
 0x269   : > { %v558_v57 = vmul.f32 %v927_v55, %v524_v41 }
 0x26a   : > { %566 = vst [vmem:[%s1205_s6 + $0x18] sm:$0xff] %v562_v56 }
 0x26b   : > { %564 = vst [vmem:[%s1205_s6 + $0x8] sm:$0xff] %v558_v57 }
 0x26c   : > { %981 = shalt.err (!%p978_p0)
}
 0x26d   : > { %s982_s15 = scalar_lea.hbm %s1241_s12, 512  ;;  %s986_s29 = scalar_lea.hbm %s1300_s5, 1024 }
 0x26e   : > { %p983_p3 = scmp.ne.s32.totalorder %s1241_s12, %s982_s15  ;;  %p987_p9 = scmp.lt.u32.totalorder %s1241_s12, %s1300_s5 }
 0x26f   : > { %p988_p13 = scmp.lt.u32.totalorder %s986_s29, %s982_s15  ;;  %p990_p2 = scmp.lt.u32.totalorder %s982_s15, %s1241_s12 }
 0x270   : > { %p984_p5 = pnand %p983_p3, %p1312_p4 }
 0x271   : > { %p989_p1 = por %p988_p13, %p987_p9 }
 0x272   : > { %p985_p7 = pneg %p984_p5 }
 0x273   : > { %p991_p6 = por %p990_p2, %p989_p1 }
 0x275   : > { %p992_p8 = pnand %p991_p6, %p985_p7 }
 0x277   : > { %995 = shalt.err (!%p992_p8)
}
 0x278   : > { %s1062_s13 = smov 128   ;;  %s1063_s16 = smov 8  }
 0x279   : > { %830 = dma.vmem_to_hbm [thread:$0]  (%p1312_p4), %s1243_s17, 512, %s1241_s12, %s1249_s25, %s1062_s13, %s1062_s13, %s1063_s16  }
 0x27a PF: > { %p842_p10 = scmp.ge.s32.totalorder %s1052_s27, 2  ;;  %s596_s14 = sand.u32 1, %s1032_s23  }
 0x27b   : > { %p1313_p11 = scmp.ne.s32.totalorder %s1306_s9, 0  ;;  %s597_s11 = scalar_lea.sflag [#allocation8], %s596_s14 }
 0x27d   : > { %p837_p12 = pnand %p842_p10, %p1313_p11 }
 0x27f   : > { %1027 = dma.done.wait (!%p837_p12), %s597_s11, 512  }
 0x280   : > { %1029 = vsyncadd (!%p837_p12), %s597_s11, 4294966784  ;;  %s25_s27 = sadd.s32 1, %s1052_s27   ;;  %s1314_s23 = smov %s1036_s24 }
 0x281   : > { %p22_p0 = scmp.ge.s32.totalorder %s25_s27, 4   ;;  %s1315_s24 = smov %s1040_s0 }
 0x282   : > { %s1316_s0 = smov %s1150_s10  ;;  %s1317_s25 = smov %s1048_s26 }
 0x283   : > { %s1318_s26 = smov %s1320_s30  ;;  %24 = sbr.rel (!%p22_p0) target bundleno = 20 (0x14), region = 95 }
 0x28a   :  { %602 = vsyncpa [#allocation7], 1 }
 0x28b   :  { %604 = vsyncpa [#allocation7 + $0x1], 1 }
 0x28c   :  { %605 = vsyncpa [#allocation8], 1 }
 0x28d   :  { %607 = vsyncpa [#allocation8 + $0x1], 1 }

</bundles_post_ra>
